<compile_context>
chip_gen: v7x
topology: tpu7x:2x2x1
jax: 0.10.0
libtpu: 0.0.40
codegen_flags: <defaults>
</compile_context>

<pallas_src>
import itertools

import jax
import jax.numpy as jnp
from jax.experimental import pallas as pl
from jax.experimental.pallas import tpu as pltpu


# ------------------------------- small helpers ------------------------------

def _cdiv(a, b):
    return (a + b - 1) // b


def _round_up(a, m):
    return _cdiv(a, m) * m


def _choose_hw_tiling(hw, max_tile=16384):
    """Pick (num_tiles, hw_tile) for the lane (HW) axis.

    hw_tile is always a multiple of 128 and <= max_tile (bounded VMEM footprint
    even for awkward HW), and num_tiles >= 2 whenever HW needs more than one
    128-lane vreg, so the "parallel" grid axis can be sharded across v7x's two
    TensorCores.  A^T is padded to num_tiles * hw_tile columns at init."""
    hw128 = max(128, _round_up(hw, 128))
    if hw128 <= 128:
        return 1, 128
    num_tiles = max(2, _cdiv(hw128, max_tile))
    hw_tile = _round_up(_cdiv(hw128, num_tiles), 128)
    return num_tiles, hw_tile


# ----------------------------- init-time glue ------------------------------

def compute_partial_repr(input_points, control_points):
    """U(r) = 0.5 * r^2 * log(r^2), with U(0) = 0.  Shapes: (N,2),(M,2)->(N,M)."""
    diff = input_points[:, None, :] - control_points[None, :, :]
    dist = jnp.sum(diff * diff, axis=-1)
    safe = jnp.where(dist > 0, dist, 1.0)
    rep = 0.5 * dist * jnp.log(safe)
    return jnp.where(dist > 0, rep, 0.0)


def build_tps_buffers(target_height, target_width, target_control_points,
                      *, at_dtype=jnp.bfloat16, max_hw_tile=16384):
    """Mirror of TPSGridGen.__init__.

    Returns:
      inverse_kernel         : (N+3, N+3) f32
      at                     : (N+3, HW_pad) at_dtype -- A^T = inv^T @ repr^T,
                               lane-dense, HW padded to num_tiles * hw_tile
      hw                     : true HW = target_height * target_width
      hw_tile                : lane-tile size used by the kernel
      target_coordinate_repr : (HW, N+3) f32 -- kept only for reference checks
    """
    tcp = target_control_points.astype(jnp.float32)
    N = tcp.shape[0]

    fk = jnp.zeros((N + 3, N + 3), jnp.float32)
    fk = fk.at[:N, :N].set(compute_partial_repr(tcp, tcp))
    fk = fk.at[:N, N].set(1.0)          # column -3
    fk = fk.at[N, :N].set(1.0)          # row    -3
    fk = fk.at[:N, N + 1:].set(tcp)     # columns -2:
    fk = fk.at[N + 1:, :N].set(tcp.T)   # rows    -2:
    inverse_kernel = jnp.linalg.inv(fk)

    hw = target_height * target_width
    coords = jnp.asarray(
        list(itertools.product(range(target_height), range(target_width))),
        dtype=jnp.float32,
    )
    Yc = coords[:, 0:1] * 2.0 / (target_height - 1) - 1.0
    Xc = coords[:, 1:2] * 2.0 / (target_width - 1) - 1.0
    target_coordinate = jnp.concatenate([Xc, Yc], axis=1)          # (HW, 2)

    # Build the repr directly lane-dense: (N+3, HW) with the long axis last.
    partial_t = compute_partial_repr(tcp, target_coordinate)       # (N, HW)
    repr_t = jnp.concatenate(
        [partial_t, jnp.ones((1, hw), jnp.float32), target_coordinate.T], axis=0
    )                                                              # (N+3, HW)

    # Precompute A^T = inv^T @ repr^T once (removes the serial two-matmul chain
    # from the per-call hot path), pad HW to a whole number of tiles, then cast
    # to the streaming dtype (bf16 by default: halves the dominant HBM read).
    at_f32 = jnp.matmul(inverse_kernel.T, repr_t,
                        precision=jax.lax.Precision.HIGHEST)       # (N+3, HW)
    num_tiles, hw_tile = _choose_hw_tiling(hw, max_hw_tile)
    hw_pad = num_tiles * hw_tile
    at = jnp.pad(at_f32, ((0, 0), (0, hw_pad - hw))).astype(at_dtype)

    target_coordinate_repr = repr_t.T                              # (HW, N+3)
    return inverse_kernel, at, hw, hw_tile, target_coordinate_repr


# ------------------------------ Pallas kernel -------------------------------

def _tps_forward_kernel(yt_ref, at_ref, coordt_ref):
    # yt_ref     : (rows_pad, N3)      f32   -- Y^T for all batch elements, row-padded
    # at_ref     : (N3, TH)            bf16/f32 -- tile of A^T (lane-dense, HW in lanes)
    # coordt_ref : (rows_pad, TH)      f32   -- tile of coord^T (lane-dense output)
    # Upcast the streamed A^T tile in-register; accumulate in f32 on the MXU.
    coordt_ref[...] = jnp.dot(
        yt_ref[...],
        at_ref[...].astype(jnp.float32),
        preferred_element_type=jnp.float32,
    )


def tps_grid_gen_forward(source_control_points, inverse_kernel, at, hw, hw_tile,
                         *, transpose_output=True):
    """source_control_points: (B, N, 2)
       inverse_kernel       : (N+3, N+3) f32
       at                   : (N+3, HW_pad) -- precomputed A^T from build_tps_buffers
       hw, hw_tile          : true HW and the lane-tile size chosen at init
       -> (source_coordinate, mapping_matrix)
          source_coordinate is (B, HW, 2) if transpose_output else (B, 2, HW)
          mapping_matrix    is (B, N+3, 2)
    """
    scp = source_control_points.astype(jnp.float32)
    B, N, _ = scp.shape
    N3 = N + 3
    hw_pad = at.shape[1]
    assert hw_pad % hw_tile == 0
    num_tiles = hw_pad // hw_tile

    # --- tiny pieces hoisted out of the kernel (f32, exact) ---
    Y = jnp.concatenate([scp, jnp.zeros((B, 3, 2), jnp.float32)], axis=1)  # (B, N3, 2)
    mapping_matrix = jnp.einsum("ij,bjk->bik", inverse_kernel.astype(jnp.float32), Y,
                                precision=jax.lax.Precision.HIGHEST)      # (B, N3, 2)

    # Y^T stacked over batch: rows (2b, 2b+1) are the x-row / y-row of batch b,
    # padded up to a multiple of 8 rows so the output block is a clean (8,128) tile.
    rows = 2 * B
    rows_pad = max(8, _round_up(rows, 8))
    yt = jnp.transpose(Y, (0, 2, 1)).reshape(rows, N3)                     # (2B, N3)
    yt = jnp.pad(yt, ((0, rows_pad - rows), (0, 0)))                       # (rows_pad, N3)

    at_bytes = at.size * at.dtype.itemsize
    cost = pl.CostEstimate(
        flops=2 * rows_pad * N3 * hw_pad,
        transcendentals=0,
        bytes_accessed=4 * yt.size + at_bytes + 4 * rows_pad * hw_pad,
    )

    coordt = pl.pallas_call(
        _tps_forward_kernel,
        out_shape=jax.ShapeDtypeStruct((rows_pad, hw_pad), jnp.float32),
        grid_spec=pltpu.PrefetchScalarGridSpec(
            num_scalar_prefetch=0,
            grid=(num_tiles,),
            in_specs=[
                pl.BlockSpec((rows_pad, N3), lambda h: (0, 0)),   # Y^T (shared, tiny)
                pl.BlockSpec((N3, hw_tile), lambda h: (0, h)),    # A^T tile (lane-dense)
            ],
            out_specs=pl.BlockSpec((rows_pad, hw_tile), lambda h: (0, h)),
        ),
        compiler_params=pltpu.CompilerParams(
            dimension_semantics=("parallel",),
        ),
        cost_estimate=cost,
    )(yt, at)

    coordt = coordt[:rows, :hw].reshape(B, 2, hw)
    if transpose_output:
        # PyTorch layout (B, HW, 2).  Downstream consumers that accept the
        # lane-dense (B, 2, HW) layout should pass transpose_output=False and
        # skip this extra HBM round-trip.
        source_coordinate = jnp.transpose(coordt, (0, 2, 1))
    else:
        source_coordinate = coordt
    return source_coordinate, mapping_matrix


# ---------------------------------- main ------------------------------------

if __name__ == "__main__":
    # Small, deterministic configuration: 4x4 control-point grid, 16x16 target.
    target_height, target_width = 16, 16
    grid_size = 4
    lin = jnp.linspace(-1.0, 1.0, grid_size)
    gy, gx = jnp.meshgrid(lin, lin, indexing="ij")
    target_control_points = jnp.stack([gx.ravel(), gy.ravel()], axis=1)  # (16, 2)
    N = target_control_points.shape[0]
    HW = target_height * target_width

    batch = 2
    key = jax.random.PRNGKey(0)
    perturb = 0.1 * jax.random.normal(key, (batch, N, 2), dtype=jnp.float32)
    source_control_points = target_control_points[None, :, :] + perturb

    # --- exact-parity path: A^T kept in f32 ---
    inv_k, at_f32, hw, th_f32, repr_full = build_tps_buffers(
        target_height, target_width, target_control_points, at_dtype=jnp.float32)
    sc_f32, mm_f32 = tps_grid_gen_forward(source_control_points, inv_k, at_f32, hw, th_f32)
    jax.block_until_ready((sc_f32, mm_f32))

    # --- default bandwidth-optimized path: A^T streamed in bf16 ---
    _, at_bf16, hw_b, th_b, _ = build_tps_buffers(
        target_height, target_width, target_control_points)   # at_dtype=bf16 default
    sc_bf16, mm_bf16 = tps_grid_gen_forward(source_control_points, inv_k, at_bf16, hw_b, th_b)
    jax.block_until_ready((sc_bf16, mm_bf16))

    # Reference check in plain JAX (same math as the PyTorch forward).
    Y_ref = jnp.concatenate(
        [source_control_points, jnp.zeros((batch, 3, 2), jnp.float32)], axis=1)
    mapping_ref = jnp.einsum("ij,bjk->bik", inv_k, Y_ref,
                             precision=jax.lax.Precision.HIGHEST)
    coord_ref = jnp.einsum("ij,bjk->bik", repr_full, mapping_ref,
                           precision=jax.lax.Precision.HIGHEST)

    # bf16-consistent reference (same quantized A^T the kernel streams).
    at_q = at_bf16.astype(jnp.float32)[:, :hw]                        # (N3, HW)
    coordt_q = jnp.einsum("bcj,ji->bci", jnp.transpose(Y_ref, (0, 2, 1)), at_q,
                          precision=jax.lax.Precision.HIGHEST)        # (B, 2, HW)
    coord_ref_q = jnp.transpose(coordt_q, (0, 2, 1))                  # (B, HW, 2)

    assert mm_f32.shape == (batch, N + 3, 2)
    assert sc_f32.shape == (batch, HW, 2)
    assert mm_bf16.shape == (batch, N + 3, 2)
    assert sc_bf16.shape == (batch, HW, 2)

    # f32 path: tight parity with the PyTorch-equivalent reference.
    assert jnp.allclose(mm_f32, mapping_ref, atol=1e-4, rtol=1e-4)
    assert jnp.allclose(sc_f32, coord_ref, atol=1e-3, rtol=1e-3)

    # bf16 path: mapping is exact (computed in f32 in the wrapper); coordinates
    # match the bf16-quantized math tightly and the f32 reference up to the
    # expected ~1e-2 quantization error of A^T.
    assert jnp.allclose(mm_bf16, mapping_ref, atol=1e-4, rtol=1e-4)
    assert jnp.allclose(sc_bf16, coord_ref_q, atol=1e-3, rtol=1e-3)
    assert jnp.allclose(sc_bf16, coord_ref, atol=3e-2, rtol=3e-2)

    print("KERNEL_OK")
</pallas_src>

<mosaic_0001>
module attributes {stable_mosaic.version = 11 : i64} {
  func.func @_tps_forward_kernel(%arg0: i32, %arg1: memref<8x19xf32, #tpu.memory_space<vmem>>, %arg2: memref<19x128xf32, #tpu.memory_space<vmem>>, %arg3: memref<8x128xf32, #tpu.memory_space<vmem>>) attributes {dimension_semantics = [#tpu.dimension_semantics<parallel>], iteration_bounds = array<i64: 2>, scalar_prefetch = 0 : i64, scratch_operands = 0 : i64, tpu.core_type = #tpu.core_type<tc>, window_params = [{pipeline_mode = #tpu.pipeline_mode<synchronous>, transform_indices = @transform_0, window_bounds = array<i64: 8, 19>}, {transform_indices = @transform_1, window_bounds = array<i64: 19, 128>}, {transform_indices = @transform_2, window_bounds = array<i64: 8, 128>}]} {
    %c0 = arith.constant 0 : index
    %c0_0 = arith.constant 0 : index
    %0 = vector.load %arg1[%c0, %c0_0] : memref<8x19xf32, #tpu.memory_space<vmem>>, vector<8x19xf32>
    %c0_1 = arith.constant 0 : index
    %c0_2 = arith.constant 0 : index
    %1 = vector.load %arg2[%c0_1, %c0_2] : memref<19x128xf32, #tpu.memory_space<vmem>>, vector<19x128xf32>
    %cst = arith.constant dense<0.000000e+00> : vector<8x128xf32>
    %2 = tpu.matmul %0, %1, %cst {dimension_numbers = #tpu.dot_dimension_numbers<[1], [0], [0], [1], [0, 0, 1, 1], [], []>} : vector<8x19xf32>, vector<19x128xf32>, vector<8x128xf32> -> vector<8x128xf32>
    %c0_3 = arith.constant 0 : index
    %c0_4 = arith.constant 0 : index
    %3 = vector.load %arg3[%c0_3, %c0_4] : memref<8x128xf32, #tpu.memory_space<vmem>>, vector<8x128xf32>
    tpu.vector_store %arg3[%c0_3, %c0_4], %2 {strides = array<i32>} : memref<8x128xf32, #tpu.memory_space<vmem>>, vector<8x128xf32>,
    return
  }
  func.func @transform_0(%arg0: i32) -> (i32, i32) {
    %c0_i32 = arith.constant 0 : i32
    %c0_i32_0 = arith.constant 0 : i32
    %c0_i32_1 = arith.constant 0 : i32
    return %c0_i32, %c0_i32_0 : i32, i32
  }
  func.func @transform_1(%arg0: i32) -> (i32, i32) {
    %c0_i32 = arith.constant 0 : i32
    %c0_i32_0 = arith.constant 0 : i32
    return %c0_i32, %arg0 : i32, i32
  }
  func.func @transform_2(%arg0: i32) -> (i32, i32) {
    %c0_i32 = arith.constant 0 : i32
    %c0_i32_0 = arith.constant 0 : i32
    return %c0_i32, %arg0 : i32, i32
  }
}

</mosaic_0001>

<bundles_post_ra>
// kernel: tpu_custom_call.1
= control target key start
LH: loop header
LB: loop body
LE: loop exit
PB: predicated region body
PF: predicated region fallthrough
CT: control target
= control target key end

     0   :  { %7 = vsyncpa [#allocation3], 0  ;;  %s799_s0 = inlined_call_operand.hbm [shape: f32[8,19], index: 0, kind: input, shape index: {}]   ;;  %s800_s1 = inlined_call_operand.hbm [shape: f32[19,256], index: 1, kind: input, shape index: {}]   ;;  %s801_s2 = inlined_call_operand.hbm [shape: f32[8,256], index: 2, kind: output, shape index: {}]  }
   0x1   :  { %8 = vsyncpa [#allocation6], 0 }
   0x2   :  { %10 = vsyncpa [#allocation6 + $0x1], 0 }
   0x3   :  { %11 = vsyncpa [#allocation4], 0 }
   0x4   :  { %13 = vsyncpa [#allocation4 + $0x1], 0  ;;  %s602_s9 = smov 0   ;;  %s604_s10 = smov 0  }
   0x5   :  { %s606_s11 = smov 0   ;;  %s608_s12 = smov 0  }
   0x6 LB: > { %s623_s13 = sadd.s32 4294967295, %s576_s12   ;;  %s353_s14 = sadd.s32 4294967294, %s576_s12   ;;  %s576_s12 = sphi %s608_s12, %s826_s12   ;;  %s572_s11 = sphi %s606_s11, %s825_s11   ;;  %s568_s10 = sphi %s604_s10, %s824_s10   ;;  %s564_s9 = sphi %s602_s9, %s823_s9  }
   0x7   : > { %s627_s15 = sadd.s32 1, %s576_s12   ;;  %s47_s16 = sadd.s32 1, %s572_s11 }
   0x8   : > { %s44_s17 = ssub.s32 %s576_s12, %s627_s15  ;;  %p54_p0 = scmp.ne.s32.totalorder %s572_s11, %s568_s10 }
   0x9   : > { %p45_p1 = scmp.eq.s32.totalorder %s44_s17, 0  ;;  %p55_p2 = scmp.eq.s32.totalorder %s576_s12, 0 }
   0xa   : > { %p60_p3 = scmp.ne.s32.totalorder %s568_s10, %s564_s9  ;;  %p802_p4 = scmp.eq.s32.totalorder %s623_s13, 0 }
   0xb   : > { %s639_s18 = scalar_select %p45_p1, %s572_s11, %s47_s16  }
   0xc   : > { %p641_p5 = por %p55_p2, %p54_p0  ;;  %p647_p6 = por %p802_p4, %p60_p3 }
   0xd   : > { %p84_p7 = scmp.eq.s32.totalorder %s623_s13, 1  ;;  %p90_p8 = scmp.eq.s32.totalorder %s353_s14, 1 }
   0xe   : > { %s808_s20 = scalar_select %p647_p6, 1, 0 }
   0xf   : > { %p354_p9 = scmp.ge.s32.totalorder %s576_s12, 1  ;;  %p97_p10 = scmp.lt.s32.totalorder %s576_s12, 3 }
  0x10   : > { %p654_p11 = por %p84_p7, %p54_p0  ;;  %p658_p12 = por %p90_p8, %p60_p3 }
  0x11   : > { %p662_p13 = pnand %p354_p9, %p97_p10  ;;  %s578_s24 = smov [#allocation2]  }
  0x12   : > { %s809_s21 = scalar_select %p654_p11, 1, 0 }
  0x13   : > { %s810_s22 = scalar_select %p658_p12, 1, 0 }
  0x14   : > { %s811_s23 = scalar_select %p662_p13, 1, 0 }
  0x15   : > { %p393_p2 = pneg %p662_p13  ;;  %s110_s25 = sshll.u32 %s578_s24, 4  ;;  %s111_s25 = int_to_ptr.vmem [resolvable:$true] %s110_s25 }
  0x16   : > { %p406_p4 = scmp.lt.s32.totalorder %s576_s12, 2  ;;  %p812_p0 = scmp.eq.s32.totalorder %s623_s13, 0 }
  0x17   : > { %s121_s27 = sand.u32 1, %s572_s11   ;;  %s448_s4 = scalar_lea.hbm %s799_s0, 128 }
  0x18   : > { %p672_p7 = pnand %p393_p2, %p812_p0  ;;  %p679_p3 = pnand %p406_p4, %p641_p5 }
  0x19   : > { %s383_s29 = smul.u32 24, %s121_s27  ;;  %p449_p8 = scmp.ne.s32.totalorder %s799_s0, %s448_s4 }
  0x1a   : > { %s814_s28 = scalar_select %p679_p3, 1, 0 }
  0x1b   : > { %p450_p9 = pneg %p672_p7  ;;  %p455_p4 = scmp.lt.u32.totalorder %s448_s4, %s799_s0 }
  0x1d   : > { %p451_p10 = pnand %p450_p9, %p449_p8 }
  0x1f   : > { %p452_p2 = pneg %p451_p10 }
  0x21   : > { %p457_p5 = pnand %p455_p4, %p452_p2 }
  0x23   : > { %460 = shalt.err (!%p457_p5)
}
  0x24   : > { %s461_s14 = scalar_lea.vmem %s111_s25, 128  ;;  %p469_p11 = scmp.lt.s32.totalorder %s111_s25, %s111_s25 }
  0x25   : > { %p462_p0 = scmp.ne.s32.totalorder %s111_s25, %s461_s14  ;;  %p470_p6 = scmp.lt.s32.totalorder %s461_s14, %s461_s14 }
  0x27   : > { %p464_p1 = pnand %p462_p0, %p450_p9  ;;  %p471_p13 = por %p470_p6, %p469_p11 }
  0x29   : > { %p465_p12 = pneg %p464_p1 }
  0x2b   : > { %p472_p3 = pnand %p471_p13, %p465_p12 }
  0x2d   : > { %475 = shalt.err (!%p472_p3)
}
  0x2e   : > { %396 = dma.hbm_to_vmem [thread:$0]  (!%p672_p7), %s799_s0, 128, %s111_s25, [#allocation3]  }
  0x2f   : > { %s357_s19 = sshll.u32 %s576_s12, 7  ;;  %s125_s24 = scalar_lea.vmem [#allocation5], %s383_s29 }
  0x30   : > { %s131_s30 = sshll.u32 %s125_s24, 4  ;;  %s703_s5 = scalar_lea.hbm %s800_s1, %s357_s19  ;;  %s705_s30 = int_to_ptr.vmem [resolvable:$true] %s131_s30 }
  0x31   : > { %s707_s26 = scalar_lea.sflag [#allocation6], %s121_s27  ;;  %s476_s6 = scalar_lea.hbm %s703_s5, 384 }
  0x32   : > { %p477_p6 = scmp.ne.s32.totalorder %s703_s5, %s476_s6  ;;  %p815_p11 = scmp.ne.s32.totalorder %s814_s28, 0 }
  0x33   : > { %s481_s7 = scalar_lea.hbm %s800_s1, 768  ;;  %p482_p7 = scmp.lt.u32.totalorder %s703_s5, %s800_s1 }
  0x34   : > { %p478_p12 = pneg %p815_p11  ;;  %p483_p3 = scmp.lt.u32.totalorder %s481_s7, %s476_s6 }
  0x35   : > { %p485_p9 = scmp.lt.u32.totalorder %s476_s6, %s703_s5 }
  0x36   : > { %p479_p13 = pnand %p478_p12, %p477_p6  ;;  %p484_p8 = por %p483_p3, %p482_p7 }
  0x38   : > { %p480_p1 = pneg %p479_p13  ;;  %p486_p10 = por %p485_p9, %p484_p8 }
  0x3a   : > { %p487_p2 = pnand %p486_p10, %p480_p1 }
  0x3c   : > { %490 = shalt.err (!%p487_p2)
}
  0x3d   : > { %s491_s27 = scalar_lea.vmem %s705_s30, 384  ;;  %s579_s16 = smov [#allocation5]  }
  0x3e   : > { %p492_p4 = scmp.ne.s32.totalorder %s705_s30, %s491_s27  ;;  %s496_s17 = sshll.u32 %s579_s16, 4  ;;  %s497_s17 = int_to_ptr.vmem [resolvable:$false] %s496_s17 }
  0x3f   : > { %s498_s19 = scalar_lea.vmem %s497_s17, 768  ;;  %p499_p6 = scmp.lt.s32.totalorder %s705_s30, %s497_s17 }
  0x40   : > { %p494_p5 = pnand %p492_p4, %p478_p12  ;;  %p500_p13 = scmp.lt.s32.totalorder %s498_s19, %s491_s27 }
  0x42   : > { %p495_p0 = pneg %p494_p5  ;;  %p501_p7 = por %p500_p13, %p499_p6 }
  0x44   : > { %p502_p3 = pnand %p501_p7, %p495_p0 }
  0x46   : > { %505 = shalt.err (!%p502_p3)
}
  0x47   : > { %s580_s24 = smov 256   ;;  %s581_s3 = smov 128  }
  0x48   : > { %s582_s4 = smov 8   ;;  %p816_p12 = scmp.ne.s32.totalorder %s811_s23, 0 }
  0x49   : > { %400 = dma.hbm_to_vmem [thread:$0]  (!%p815_p11), %s703_s5, 384, %s705_s30, %s707_s26, %s580_s24, %s581_s3, %s582_s4  }
  0x4a   : > { %143 = sbr.rel (%p816_p12) target bundleno = 321 (0x141), region = 28  ;;  %p817_p1 = scmp.eq.s32.totalorder (!%p816_p12), %s623_s13, 0 }
  0x51   : > { %551 = dma.done.wait (%p817_p1), [#allocation3], 128   ;;  %p818_p8 = pmov %p817_p1 }
  0x52   : > { %s742_s6 = sand.u32 1, %s568_s10   ;;  %p819_p9 = scmp.ne.s32.totalorder %s808_s20, 0 }
  0x53   : > { %553 = vsyncadd (%p818_p8), [#allocation3], 4294967168  ;;  %s384_s25 = smul.u32 24, %s742_s6  ;;  %s150_s29 = scalar_lea.sflag [#allocation6], %s742_s6 }
  0x55   : > { %s153_s7 = scalar_lea.vmem [#allocation5], %s384_s25 }
  0x56   : > { %555 = dma.done.wait (%p819_p9), %s150_s29, 384  }
  0x57   : > { %557 = vsyncadd (%p819_p9), %s150_s29, 4294966912  ;;  %v583_v0 = vmov 0.0|0.0   ;;  %vm584_vm0 = vmmov 0   ;;  %v585_v1 = vmov 0.0   ;;  %v175_v2 = vld [vmem:[%s153_s7] sm:$0xff]  ;;  %v176_v3 = vld [vmem:[%s153_s7 + $0x8] sm:$0xff] }
  0x58   : > { %380 = vmatprep.subr.bf16.mxu0 %v583_v0  ;;  %377 = vmatprep.mubr.msk.f32.mxu0 %vm584_vm0, %v585_v1  ;;  %v381_v4 = vpack.c.bf16 %v176_v3, %v175_v2  ;;  %v177_v5 = vld [vmem:[%s153_s7 + $0x10] sm:$0x7]  ;;  %vm182_vm1 = vcmask 1042432   ;;  %v174_v6 = vld [vmem:[#allocation2] sm:$0xff]  ;;  %vm178_vm2 = vcmask 154624   ;;  %s360_s20 = sshll.u32 %s742_s6, 3 }
  0x59   : > { %s173_s23 = scalar_lea.vmem [#allocation7], %s360_s20  ;;  %s364_s30 = sshll.u32 %s623_s13, 7 }
  0x5a   : > { %382 = vmatpush3.bf16.msra.mxu0 %v381_v4  ;;  %s271_s28 = sshll.u32 %s173_s23, 4  ;;  %s757_s8 = scalar_lea.hbm %s801_s2, %s364_s30  ;;  %s752_s28 = int_to_ptr.vmem [resolvable:$true] %s271_s28 }
  0x5b   : > { %375 = vmatprep.subr.mxu0 %v585_v1  ;;  %s258_s14 = scalar_lea.sflag [#allocation4], %s742_s6  ;;  %s506_s27 = scalar_lea.vmem %s752_s28, 128 }
  0x5c   : > { %p507_p11 = scmp.ne.s32.totalorder %s752_s28, %s506_s27  ;;  %p820_p10 = scmp.ne.s32.totalorder %s809_s21, 0 }
  0x5d   : > { %s586_s13 = smov [#allocation7]  }
  0x5e   : > { %376 = vmatpush3.msk.msra.mxu0 %vm182_vm1, %v177_v5  ;;  %p508_p2 = pnand %p507_p11, %p820_p10  ;;  %s510_s16 = sshll.u32 %s586_s13, 4  ;;  %s511_s16 = int_to_ptr.vmem [resolvable:$false] %s510_s16 }
  0x5f   : > { %378 = vmatmul.mubr.msk.f32.vlgmr.msra.gmra.mrb[0].mxu0 %vm178_vm2, %v174_v6  ;;  %s512_s17 = scalar_lea.vmem %s511_s16, 256  ;;  %p513_p5 = scmp.lt.s32.totalorder %s752_s28, %s511_s16 }
  0x60   : > { %p509_p4 = pneg %p508_p2  ;;  %p514_p0 = scmp.lt.s32.totalorder %s512_s17, %s506_s27 }
  0x62   : > { %p515_p6 = por %p514_p0, %p513_p5 }
  0x64   : > { %p516_p13 = pnand %p515_p6, %p509_p4 }
 0x132   : > { %v252_v7 = vpop.f32.mrb[0].mxu0 }
 0x133   : > { %256 = vst [vmem:[%s173_s23] sm:$0xff] %v252_v7  ;;  %v379_v8 = vpop.f32.mrb[1].mxu0 }
 0x134   : > { %519 = shalt.err (!%p516_p13)
}
 0x135   : > { %s520_s19 = scalar_lea.hbm %s757_s8, 128  ;;  %s524_s4 = scalar_lea.hbm %s801_s2, 256 }
 0x136   : > { %p521_p7 = scmp.ne.s32.totalorder %s757_s8, %s520_s19  ;;  %p525_p1 = scmp.lt.u32.totalorder %s757_s8, %s801_s2 }
 0x137   : > { %p526_p8 = scmp.lt.u32.totalorder %s524_s4, %s520_s19  ;;  %p528_p11 = scmp.lt.u32.totalorder %s520_s19, %s757_s8 }
 0x138   : > { %p522_p3 = pnand %p521_p7, %p820_p10 }
 0x139   : > { %p527_p9 = por %p526_p8, %p525_p1 }
 0x13a   : > { %p523_p12 = pneg %p522_p3 }
 0x13b   : > { %p529_p2 = por %p528_p11, %p527_p9 }
 0x13d   : > { %p530_p4 = pnand %p529_p2, %p523_p12 }
 0x13f   : > { %533 = shalt.err (!%p530_p4)
}
 0x140   : > { %391 = dma.vmem_to_hbm [thread:$0]  (%p820_p10), %s752_s28, 128, %s757_s8, %s258_s14  }
 0x141 PF: > { %s283_s29 = sand.u32 1, %s564_s9   ;;  %p821_p5 = scmp.ne.s32.totalorder %s810_s22, 0 }
 0x142   : > { %p822_p0 = scmp.ge.s32.totalorder %s576_s12, 2  ;;  %s284_s7 = scalar_lea.sflag [#allocation4], %s283_s29 }
 0x144   : > { %p402_p6 = pnand %p822_p0, %p821_p5 }
 0x146   : > { %559 = dma.done.wait (!%p402_p6), %s284_s7, 128  }
 0x147   : > { %561 = vsyncadd (!%p402_p6), %s284_s7, 4294967168  ;;  %p16_p13 = scmp.ge.s32.totalorder %s627_s15, 4   ;;  %s823_s9 = smov %s568_s10 }
 0x148   : > { %s824_s10 = smov %s572_s11  ;;  %s825_s11 = smov %s639_s18 }
 0x149   : > { %s826_s12 = smov %s627_s15  ;;  %18 = sbr.rel (!%p16_p13) target bundleno = 6 (0x6), region = 78 }
 0x150   :  { %289 = vsyncpa [#allocation3], 1 }
 0x151   :  { %291 = vsyncpa [#allocation3 + $0x1], 1 }
 0x152   :  { %292 = vsyncpa [#allocation6], 1 }
 0x153   :  { %294 = vsyncpa [#allocation6 + $0x1], 1 }
 0x154   :  { %295 = vsyncpa [#allocation4], 1 }
 0x155   :  { %297 = vsyncpa [#allocation4 + $0x1], 1 }

</bundles_post_ra>
